<compile_context>
chip_gen: v5e
topology: v5e:2x2
jax: 0.10.0
libtpu: 0.0.40
codegen_flags: <defaults>
</compile_context>

<pallas_src>
import functools

import jax
import jax.numpy as jnp
from jax.experimental import pallas as pl
from jax.experimental.pallas import tpu as pltpu

LANES = 128  # packed output slab width (one full lane register row)


# ----------------------------------------------------------------------------
# Fused kernel: graph contraction (folded mean-pool) + VAE head.
# Per grid step (one half of the stacked pos/neg batch, Bb rows):
#   gv     = sum_s w_adj[:, s] * h[:, s, :]                (Bb, H)   VPU + reduce
#   logits = gv @ W_dim + b_dim                            (Bb, T)
#   stage  = logits @ W_stage + b_stage                    (Bb, 6)   (pre-softmax logits)
#   topic  = softmax(logits, axis=1)
#   recon  = topic @ W_rec                                 (Bb, H)   (no bias)
#   out    = [gv | recon | topic | stage | 0-pad]          (Bb, 128) lane-dense
# ----------------------------------------------------------------------------
def fused_vae_kernel(h_ref, wadj_ref, wdim_ref, bdim_ref, wstage_ref,
                     bstage_ref, wrec_ref, out_ref, *, H, T, NSTAGE):
    h = h_ref[...]                                                     # (Bb, S, H)
    w = wadj_ref[...]                                                  # (Bb, S)

    # Folded adjacency mean-pool: weighted sum over the sequence axis.
    gv = jnp.sum(h * w[:, :, None], axis=1)                            # (Bb, H)

    logits = jnp.dot(gv, wdim_ref[...],
                     preferred_element_type=jnp.float32) + bdim_ref[...]   # (Bb, T)
    stage = jnp.dot(logits, wstage_ref[...],
                    preferred_element_type=jnp.float32) + bstage_ref[...]  # (Bb, 6)

    m = jnp.max(logits, axis=1, keepdims=True)
    e = jnp.exp(logits - m)
    topic = e * pl.reciprocal(jnp.sum(e, axis=1, keepdims=True), approx=False)

    recon = jnp.dot(topic, wrec_ref[...],
                    preferred_element_type=jnp.float32)                # (Bb, H)

    # Pack everything into one lane-dense (Bb, 128) slab.
    out_ref[...] = jnp.zeros_like(out_ref)
    out_ref[:, 0:H] = gv
    out_ref[:, H:2 * H] = recon
    out_ref[:, 2 * H:2 * H + T] = topic
    out_ref[:, 2 * H + T:2 * H + T + NSTAGE] = stage


def fused_vae_call(h, w_adj, w_dim, b_dim, w_stage, b_stage, w_rec,
                   *, batch_per_step):
    twoB, S, H = h.shape
    T = w_dim.shape[1]
    NSTAGE = w_stage.shape[1]
    assert 2 * H + T + NSTAGE <= LANES, "packed slab does not fit in 128 lanes"
    assert twoB % batch_per_step == 0
    n_steps = twoB // batch_per_step

    kernel = functools.partial(fused_vae_kernel, H=H, T=T, NSTAGE=NSTAGE)

    slab = pl.pallas_call(
        kernel,
        out_shape=jax.ShapeDtypeStruct((twoB, LANES), jnp.float32),
        grid_spec=pltpu.PrefetchScalarGridSpec(
            num_scalar_prefetch=0,
            grid=(n_steps,),
            in_specs=[
                pl.BlockSpec((batch_per_step, S, H), lambda g: (g, 0, 0)),
                pl.BlockSpec((batch_per_step, S), lambda g: (g, 0)),
                pl.BlockSpec((H, T), lambda g: (0, 0)),
                pl.BlockSpec((1, T), lambda g: (0, 0)),
                pl.BlockSpec((T, NSTAGE), lambda g: (0, 0)),
                pl.BlockSpec((1, NSTAGE), lambda g: (0, 0)),
                pl.BlockSpec((T, H), lambda g: (0, 0)),
            ],
            out_specs=pl.BlockSpec((batch_per_step, LANES), lambda g: (g, 0)),
        ),
        compiler_params=pltpu.CompilerParams(
            dimension_semantics=("parallel",)),   # pos/neg halves -> 2 TCs on v7x
    )(h, w_adj, w_dim, b_dim.reshape(1, T), w_stage, b_stage.reshape(1, NSTAGE),
      w_rec)
    return slab


# ----------------------------------------------------------------------------
# Full TempVAE forward. Embedding gathers and the tiny adjacency column-mean
# stay in XLA (no Pallas win at these scales); everything else runs in the one
# fused Pallas kernel above.
# ----------------------------------------------------------------------------
def temp_vae_forward(params, x, neg_x, segment_label, neg_segment_label,
                     adj_mat, neg_adj_mat, train=False):
    del train  # inference semantics; dropout etc. would live inside BERTGraph

    B, S = x.shape
    H = params["token_emb"].shape[1]
    T = params["w_dim"].shape[1]
    NSTAGE = params["w_stage"].shape[1]

    # Stack pos / neg along batch so one kernel call handles both.
    tokens = jnp.concatenate([x, neg_x], axis=0)                        # (2B, S)
    segs = jnp.concatenate([segment_label, neg_segment_label], axis=0)  # (2B, S)
    adj = jnp.concatenate([adj_mat, neg_adj_mat], axis=0).astype(jnp.float32)

    # BERTGraph stand-in preprocessing: embedding gather + add.
    h = (jnp.take(params["token_emb"], tokens, axis=0)
         + jnp.take(params["segment_emb"], segs, axis=0))               # (2B, S, H)

    # Folded mean-pool weights: mean over adjacency rows (column means).
    # mean(adj @ h, axis=rows) == colmean(adj) @ h
    w_adj = jnp.mean(adj, axis=1)                                       # (2B, S)

    slab = fused_vae_call(
        h, w_adj,
        params["w_dim"], params["b_dim"],
        params["w_stage"], params["b_stage"],
        params["w_rec"],
        batch_per_step=B,
    )                                                                   # (2B, 128)

    graph_vec = slab[:B, 0:H]
    neg_graph_vec = slab[B:, 0:H]
    reconstructed_vec = slab[:B, H:2 * H]
    topic_dist = slab[:B, 2 * H:2 * H + T]
    stage_vec = slab[:B, 2 * H + T:2 * H + T + NSTAGE]

    return (reconstructed_vec, graph_vec, neg_graph_vec, topic_dist, stage_vec)


# ----------------------------------------------------------------------------
# Deterministic parameter construction (shapes implied by __init__:
#   dim_reduction: Linear(H, n_topics), reconstruction: Linear(n_topics, H, bias=False),
#   spv_stage_label: Linear(n_topics, 6)); Linear weights stored transposed so
#   the kernel computes y = x @ W + b.
# ----------------------------------------------------------------------------
def make_params(key, vocab, n_segments, H, T, n_stage):
    ks = jax.random.split(key, 6)
    scale = 0.02
    return {
        "token_emb":   scale * jax.random.normal(ks[0], (vocab, H), jnp.float32),
        "segment_emb": scale * jax.random.normal(ks[1], (n_segments, H), jnp.float32),
        "w_dim":       scale * jax.random.normal(ks[2], (H, T), jnp.float32),
        "b_dim":       jnp.zeros((T,), jnp.float32),
        "w_stage":     scale * jax.random.normal(ks[3], (T, n_stage), jnp.float32),
        "b_stage":     jnp.zeros((n_stage,), jnp.float32),
        "w_rec":       scale * jax.random.normal(ks[4], (T, H), jnp.float32),
    }


# Pure-JAX reference (unfolded math) for correctness checking.
def temp_vae_reference(params, x, neg_x, segment_label, neg_segment_label,
                       adj_mat, neg_adj_mat):
    def graph(tokens, segs, adj):
        h = (jnp.take(params["token_emb"], tokens, axis=0)
             + jnp.take(params["segment_emb"], segs, axis=0))
        agg = jnp.einsum("bij,bjh->bih", adj.astype(jnp.float32), h)
        return jnp.mean(agg, axis=1)

    gv = graph(x, segment_label, adj_mat)
    ngv = graph(neg_x, neg_segment_label, neg_adj_mat)
    logits = gv @ params["w_dim"] + params["b_dim"]
    stage = logits @ params["w_stage"] + params["b_stage"]
    topic = jax.nn.softmax(logits, axis=1)
    recon = topic @ params["w_rec"]
    return (recon, gv, ngv, topic, stage)


if __name__ == "__main__":
    B, S, H, V, T, NSTAGE, NSEG = 8, 8, 32, 32, 5, 6, 3

    key = jax.random.PRNGKey(0)
    k_in, k_par = jax.random.split(key)
    ks = jax.random.split(k_in, 6)

    x = jax.random.randint(ks[0], (B, S), 0, V, dtype=jnp.int32)
    neg_x = jax.random.randint(ks[1], (B, S), 0, V, dtype=jnp.int32)
    segment_label = jax.random.randint(ks[2], (B, S), 0, NSEG, dtype=jnp.int32)
    neg_segment_label = jax.random.randint(ks[3], (B, S), 0, NSEG, dtype=jnp.int32)
    adj_mat = (jax.random.uniform(ks[4], (B, S, S)) > 0.5).astype(jnp.float32)
    neg_adj_mat = (jax.random.uniform(ks[5], (B, S, S)) > 0.5).astype(jnp.float32)

    params = make_params(k_par, V, NSEG, H, T, NSTAGE)

    outs = temp_vae_forward(params, x, neg_x, segment_label, neg_segment_label,
                            adj_mat, neg_adj_mat, train=False)
    jax.block_until_ready(outs)

    recon, gv, ngv, topic, stage = outs
    assert recon.shape == (B, H) and gv.shape == (B, H) and ngv.shape == (B, H)
    assert topic.shape == (B, T) and stage.shape == (B, NSTAGE)
    # softmax rows sum to 1 (exact reciprocal kept in-kernel)
    assert jnp.allclose(jnp.sum(topic, axis=1), 1.0, atol=1e-5)

    # Compare against the pure-JAX reference (unfolded mean-pool).
    ref = temp_vae_reference(params, x, neg_x, segment_label, neg_segment_label,
                             adj_mat, neg_adj_mat)
    for got, want in zip(outs, ref):
        assert jnp.allclose(got, want, rtol=1e-4, atol=1e-5), "mismatch vs reference"

    print("KERNEL_OK")
</pallas_src>

<mosaic_0001>
module attributes {stable_mosaic.version = 11 : i64} {
  func.func @fused_vae_kernel(%arg0: i32, %arg1: memref<8x8x32xf32, #tpu.memory_space<vmem>>, %arg2: memref<8x8xf32, #tpu.memory_space<vmem>>, %arg3: memref<32x5xf32, #tpu.memory_space<vmem>>, %arg4: memref<1x5xf32, #tpu.memory_space<vmem>>, %arg5: memref<5x6xf32, #tpu.memory_space<vmem>>, %arg6: memref<1x6xf32, #tpu.memory_space<vmem>>, %arg7: memref<5x32xf32, #tpu.memory_space<vmem>>, %arg8: memref<8x128xf32, #tpu.memory_space<vmem>>) attributes {dimension_semantics = [#tpu.dimension_semantics<parallel>], iteration_bounds = array<i64: 2>, scalar_prefetch = 0 : i64, scratch_operands = 0 : i64, tpu.core_type = #tpu.core_type<tc>, window_params = [{transform_indices = @transform_0, window_bounds = array<i64: 8, 8, 32>}, {transform_indices = @transform_1, window_bounds = array<i64: 8, 8>}, {pipeline_mode = #tpu.pipeline_mode<synchronous>, transform_indices = @transform_2, window_bounds = array<i64: 32, 5>}, {pipeline_mode = #tpu.pipeline_mode<synchronous>, transform_indices = @transform_3, window_bounds = array<i64: 1, 5>}, {pipeline_mode = #tpu.pipeline_mode<synchronous>, transform_indices = @transform_4, window_bounds = array<i64: 5, 6>}, {pipeline_mode = #tpu.pipeline_mode<synchronous>, transform_indices = @transform_5, window_bounds = array<i64: 1, 6>}, {pipeline_mode = #tpu.pipeline_mode<synchronous>, transform_indices = @transform_6, window_bounds = array<i64: 5, 32>}, {transform_indices = @transform_7, window_bounds = array<i64: 8, 128>}]} {
    %c0 = arith.constant 0 : index
    %c0_0 = arith.constant 0 : index
    %c0_1 = arith.constant 0 : index
    %0 = vector.load %arg1[%c0, %c0_0, %c0_1] : memref<8x8x32xf32, #tpu.memory_space<vmem>>, vector<8x8x32xf32>
    %c0_2 = arith.constant 0 : index
    %c0_3 = arith.constant 0 : index
    %1 = vector.load %arg2[%c0_2, %c0_3] : memref<8x8xf32, #tpu.memory_space<vmem>>, vector<8x8xf32>
    %2 = vector.shape_cast %1 : vector<8x8xf32> to vector<8x8x1xf32>
    %3 = vector.broadcast %2 : vector<8x8x1xf32> to vector<8x8x32xf32>
    %4 = arith.mulf %0, %3 : vector<8x8x32xf32>
    %cst = arith.constant dense<0.000000e+00> : vector<8x32xf32>
    %5 = vector.multi_reduction <add>, %4, %cst [1] : vector<8x8x32xf32> to vector<8x32xf32>
    %c0_4 = arith.constant 0 : index
    %c0_5 = arith.constant 0 : index
    %6 = vector.load %arg3[%c0_4, %c0_5] : memref<32x5xf32, #tpu.memory_space<vmem>>, vector<32x5xf32>
    %cst_6 = arith.constant dense<0.000000e+00> : vector<8x5xf32>
    %7 = tpu.matmul %5, %6, %cst_6 {dimension_numbers = #tpu.dot_dimension_numbers<[1], [0], [0], [1], [0, 0, 1, 1], [], []>} : vector<8x32xf32>, vector<32x5xf32>, vector<8x5xf32> -> vector<8x5xf32>
    %c0_7 = arith.constant 0 : index
    %c0_8 = arith.constant 0 : index
    %8 = vector.load %arg4[%c0_7, %c0_8] : memref<1x5xf32, #tpu.memory_space<vmem>>, vector<1x5xf32>
    %9 = vector.broadcast %8 : vector<1x5xf32> to vector<8x5xf32>
    %10 = arith.addf %7, %9 : vector<8x5xf32>
    %c0_9 = arith.constant 0 : index
    %c0_10 = arith.constant 0 : index
    %11 = vector.load %arg5[%c0_9, %c0_10] : memref<5x6xf32, #tpu.memory_space<vmem>>, vector<5x6xf32>
    %cst_11 = arith.constant dense<0.000000e+00> : vector<8x6xf32>
    %12 = tpu.matmul %10, %11, %cst_11 {dimension_numbers = #tpu.dot_dimension_numbers<[1], [0], [0], [1], [0, 0, 1, 1], [], []>} : vector<8x5xf32>, vector<5x6xf32>, vector<8x6xf32> -> vector<8x6xf32>
    %c0_12 = arith.constant 0 : index
    %c0_13 = arith.constant 0 : index
    %13 = vector.load %arg6[%c0_12, %c0_13] : memref<1x6xf32, #tpu.memory_space<vmem>>, vector<1x6xf32>
    %14 = vector.broadcast %13 : vector<1x6xf32> to vector<8x6xf32>
    %15 = arith.addf %12, %14 : vector<8x6xf32>
    %cst_14 = arith.constant dense<0xFF800000> : vector<8xf32>
    %16 = vector.multi_reduction <maximumf>, %10, %cst_14 [1] : vector<8x5xf32> to vector<8xf32>
    %17 = vector.shape_cast %16 : vector<8xf32> to vector<8x1xf32>
    %18 = vector.broadcast %17 : vector<8x1xf32> to vector<8x5xf32>
    %19 = arith.subf %10, %18 : vector<8x5xf32>
    %20 = math.exp %19 : vector<8x5xf32>
    %cst_15 = arith.constant dense<0.000000e+00> : vector<8xf32>
    %21 = vector.multi_reduction <add>, %20, %cst_15 [1] : vector<8x5xf32> to vector<8xf32>
    %22 = vector.shape_cast %21 : vector<8xf32> to vector<8x1xf32>
    %23 = tpu.reciprocal %22 : vector<8x1xf32> -> vector<8x1xf32>
    %24 = vector.broadcast %23 : vector<8x1xf32> to vector<8x5xf32>
    %25 = arith.mulf %20, %24 : vector<8x5xf32>
    %c0_16 = arith.constant 0 : index
    %c0_17 = arith.constant 0 : index
    %26 = vector.load %arg7[%c0_16, %c0_17] : memref<5x32xf32, #tpu.memory_space<vmem>>, vector<5x32xf32>
    %cst_18 = arith.constant dense<0.000000e+00> : vector<8x32xf32>
    %27 = tpu.matmul %25, %26, %cst_18 {dimension_numbers = #tpu.dot_dimension_numbers<[1], [0], [0], [1], [0, 0, 1, 1], [], []>} : vector<8x5xf32>, vector<5x32xf32>, vector<8x32xf32> -> vector<8x32xf32>
    %cst_19 = arith.constant 0.000000e+00 : f32
    %28 = vector.broadcast %cst_19 : f32 to vector<8x128xf32>
    %c0_20 = arith.constant 0 : index
    %c0_21 = arith.constant 0 : index
    %29 = vector.load %arg8[%c0_20, %c0_21] : memref<8x128xf32, #tpu.memory_space<vmem>>, vector<8x128xf32>
    tpu.vector_store %arg8[%c0_20, %c0_21], %28 {strides = array<i32>} : memref<8x128xf32, #tpu.memory_space<vmem>>, vector<8x128xf32>,
    %c0_22 = arith.constant 0 : index
    %c0_23 = arith.constant 0 : index
    %30 = vector.load %arg8[%c0_22, %c0_23] : memref<8x128xf32, #tpu.memory_space<vmem>>, vector<8x32xf32>
    tpu.vector_store %arg8[%c0_22, %c0_23], %5 {strides = array<i32>} : memref<8x128xf32, #tpu.memory_space<vmem>>, vector<8x32xf32>,
    %c0_24 = arith.constant 0 : index
    %c32 = arith.constant 32 : index
    %31 = vector.load %arg8[%c0_24, %c32] : memref<8x128xf32, #tpu.memory_space<vmem>>, vector<8x32xf32>
    tpu.vector_store %arg8[%c0_24, %c32], %27 {strides = array<i32>} : memref<8x128xf32, #tpu.memory_space<vmem>>, vector<8x32xf32>,
    %c0_25 = arith.constant 0 : index
    %c64 = arith.constant 64 : index
    %32 = vector.load %arg8[%c0_25, %c64] : memref<8x128xf32, #tpu.memory_space<vmem>>, vector<8x5xf32>
    tpu.vector_store %arg8[%c0_25, %c64], %25 {strides = array<i32>} : memref<8x128xf32, #tpu.memory_space<vmem>>, vector<8x5xf32>,
    %c0_26 = arith.constant 0 : index
    %c69 = arith.constant 69 : index
    %33 = vector.load %arg8[%c0_26, %c69] : memref<8x128xf32, #tpu.memory_space<vmem>>, vector<8x6xf32>
    tpu.vector_store %arg8[%c0_26, %c69], %15 {strides = array<i32>} : memref<8x128xf32, #tpu.memory_space<vmem>>, vector<8x6xf32>,
    return
  }
  func.func @transform_0(%arg0: i32) -> (i32, i32, i32) {
    %c0_i32 = arith.constant 0 : i32
    %c0_i32_0 = arith.constant 0 : i32
    %c0_i32_1 = arith.constant 0 : i32
    return %arg0, %c0_i32, %c0_i32_0 : i32, i32, i32
  }
  func.func @transform_1(%arg0: i32) -> (i32, i32) {
    %c0_i32 = arith.constant 0 : i32
    %c0_i32_0 = arith.constant 0 : i32
    return %arg0, %c0_i32 : i32, i32
  }
  func.func @transform_2(%arg0: i32) -> (i32, i32) {
    %c0_i32 = arith.constant 0 : i32
    %c0_i32_0 = arith.constant 0 : i32
    %c0_i32_1 = arith.constant 0 : i32
    return %c0_i32, %c0_i32_0 : i32, i32
  }
  func.func @transform_3(%arg0: i32) -> (i32, i32) {
    %c0_i32 = arith.constant 0 : i32
    %c0_i32_0 = arith.constant 0 : i32
    %c0_i32_1 = arith.constant 0 : i32
    return %c0_i32, %c0_i32_0 : i32, i32
  }
  func.func @transform_4(%arg0: i32) -> (i32, i32) {
    %c0_i32 = arith.constant 0 : i32
    %c0_i32_0 = arith.constant 0 : i32
    %c0_i32_1 = arith.constant 0 : i32
    return %c0_i32, %c0_i32_0 : i32, i32
  }
  func.func @transform_5(%arg0: i32) -> (i32, i32) {
    %c0_i32 = arith.constant 0 : i32
    %c0_i32_0 = arith.constant 0 : i32
    %c0_i32_1 = arith.constant 0 : i32
    return %c0_i32, %c0_i32_0 : i32, i32
  }
  func.func @transform_6(%arg0: i32) -> (i32, i32) {
    %c0_i32 = arith.constant 0 : i32
    %c0_i32_0 = arith.constant 0 : i32
    %c0_i32_1 = arith.constant 0 : i32
    return %c0_i32, %c0_i32_0 : i32, i32
  }
  func.func @transform_7(%arg0: i32) -> (i32, i32) {
    %c0_i32 = arith.constant 0 : i32
    %c0_i32_0 = arith.constant 0 : i32
    return %arg0, %c0_i32 : i32, i32
  }
}

</mosaic_0001>

<bundles_post_ra>
// kernel: tpu_custom_call.1
= control target key start
LH: loop header
LB: loop body
LE: loop exit
PB: predicated region body
PF: predicated region fallthrough
CT: control target
= control target key end

     0   :  { %12 = vsyncpa [#allocation3], 0  ;;  %s1117_s0 = inlined_call_operand.hbm [shape: f32[16,8,32], index: 0, kind: input, shape index: {}]   ;;  %s1118_s1 = inlined_call_operand.vmem [shape: f32[16,8], index: 1, kind: input, shape index: {}]   ;;  %s1119_s2 = inlined_call_operand.vmem [shape: f32[32,5], index: 2, kind: input, shape index: {}]   ;;  %s1120_s3 = inlined_call_operand.vmem [shape: f32[1,5], index: 3, kind: input, shape index: {}]   ;;  %s1121_s4 = inlined_call_operand.vmem [shape: f32[5,6], index: 4, kind: input, shape index: {}]   ;;  %s1122_s5 = inlined_call_operand.vmem [shape: f32[1,6], index: 5, kind: input, shape index: {}]   ;;  %s1123_s6 = inlined_call_operand.vmem [shape: f32[5,32], index: 6, kind: input, shape index: {}]   ;;  %s1124_s7 = inlined_call_operand.hbm [shape: f32[16,128], index: 7, kind: output, shape index: {}]  }
   0x1   :  { %14 = vsyncpa [#allocation3 + $0x1], 0 }
   0x2   :  { %15 = vsyncpa [#allocation4], 0 }
   0x3   :  { %17 = vsyncpa [#allocation4 + $0x1], 0  ;;  %s926_s24 = smov 0   ;;  %s928_s25 = smov 0  }
   0x4   :  { %s930_s26 = smov 0   ;;  %s932_s27 = smov 0  }
   0x5 LB: > { %s947_s28 = sadd.s32 4294967295, %s878_s27   ;;  %s701_s29 = sadd.s32 4294967294, %s878_s27   ;;  %s878_s27 = sphi %s932_s27, %s1136_s27   ;;  %s874_s26 = sphi %s930_s26, %s1135_s26   ;;  %s870_s25 = sphi %s928_s25, %s1134_s25   ;;  %s866_s24 = sphi %s926_s24, %s1133_s24  }
   0x6   : > { %s951_s30 = sadd.s32 1, %s878_s27   ;;  %s30_s8 = sadd.s32 1, %s874_s26 }
   0x7   : > { %s27_s9 = ssub.s32 %s878_s27, %s951_s30  ;;  %p37_p0 = scmp.ne.s32.totalorder %s874_s26, %s870_s25 }
   0x8   : > { %p28_p1 = scmp.eq.s32.totalorder %s27_s9, 0  ;;  %p38_p2 = scmp.eq.s32.totalorder %s878_s27, 0 }
   0x9   : > { %p43_p3 = scmp.ne.s32.totalorder %s870_s25, %s866_s24  ;;  %p44_p4 = scmp.eq.s32.totalorder %s947_s28, 0 }
   0xa   : > { %s963_s10 = scalar_select %p28_p1, %s874_s26, %s30_s8  }
   0xb   : > { %p965_p5 = por %p38_p2, %p37_p0  ;;  %p969_p6 = por %p44_p4, %p43_p3 }
   0xc   : > { %1125 = sst [smem:[#allocation8_spill]] %s963_s10  ;;  %p198_p7 = scmp.eq.s32.totalorder %s947_s28, 1 }
   0xd   : > { %p204_p8 = scmp.eq.s32.totalorder %s701_s29, 1  ;;  %p733_p10 = scmp.lt.s32.totalorder %s878_s27, 2 }
   0xe   : > { %p976_p11 = por %p198_p7, %p37_p0  ;;  %s239_s15 = sand.u32 1, %s874_s26  }
   0xf   : > { %p980_p12 = por %p204_p8, %p43_p3  ;;  %s720_s16 = sshll.u32 %s878_s27, 6 }
  0x10   : > { %s704_s17 = sshll.u32 %s239_s15, 6  ;;  %s248_s20 = scalar_lea.hbm %s1117_s0, %s720_s16 }
  0x11   : > { %s249_s21 = sshll.u32 %s248_s20, 4  ;;  %s243_s22 = scalar_lea.vmem [#allocation2], %s704_s17  ;;  %s250_s21 = int_to_ptr.hbm [resolvable:$true] %s249_s21 }
  0x12   : > { %s251_s23 = sshll.u32 %s243_s22, 4  ;;  %p991_p13 = pnand %p733_p10, %p965_p5  ;;  %s252_s23 = int_to_ptr.vmem [resolvable:$true] %s251_s23 }
  0x13   : > { %p707_p0 = scmp.ge.s32.totalorder %s878_s27, 1  ;;  %p266_p1 = scmp.lt.s32.totalorder %s878_s27, 3 }
  0x14   : > { %s240_s8 = scalar_lea.sflag [#allocation3], %s239_s15  ;;  %s782_s9 = sshra.s32 %s250_s21, 4  ;;  %s783_s9 = int_to_ptr.hbm [resolvable:$true] %s782_s9 }
  0x15   : > { %s784_s10 = scalar_lea.hbm %s783_s9, 64  ;;  %p786_p3 = pneg %p991_p13 }
  0x16   : > { %p785_p2 = scmp.ne.s32.totalorder %s783_s9, %s784_s10  ;;  %s789_s11 = scalar_lea.hbm %s1117_s0, 128 }
  0x17   : > { %p790_p5 = scmp.lt.s32.totalorder %s783_s9, %s1117_s0  ;;  %p791_p8 = scmp.lt.s32.totalorder %s789_s11, %s784_s10 }
  0x18   : > { %p787_p4 = pnand %p786_p3, %p785_p2 }
  0x19   : > { %p792_p10 = por %p791_p8, %p790_p5 }
  0x1a   : > { %p788_p7 = pneg %p787_p4 }
  0x1c   : > { %p793_p9 = pnand %p792_p10, %p788_p7 }
  0x1e   : > { %796 = shalt.err (!%p793_p9)
}
  0x1f   : > { %s880_s15 = smov 128   ;;  %s881_s20 = smov 8  }
  0x20   : > { %728 = dma.hbm_to_vmem [thread:$0]  (!%p991_p13), %s250_s21, 1024, %s252_s23, %s240_s8, %s880_s15, %s880_s15, %s881_s20  }
  0x21   : > { %p267_p2 = pnand %p707_p0, %p266_p1 }
  0x22   : > { %s1012_s22 = sand.u32 (!%p267_p2), 1, %s870_s25  }
  0x23   : > { %270 = sbr.rel (%p267_p2) target bundleno = 851 (0x353), region = 48  ;;  %s708_s10 = sshll.u32 (!%p267_p2), %s1012_s22, 6 }
  0x24   : > { %s273_s9 = scalar_lea.sflag (!%p267_p2), [#allocation3], %s1012_s22  ;;  %s1016_s16 = scalar_lea.vmem (!%p267_p2), [#allocation2], %s708_s10 }
  0x28   : > { %857 = dma.done.wait (%p969_p6), %s273_s9, 1024  }
  0x29   : > { %859 = vsyncadd (%p969_p6), %s273_s9, 4294966272  ;;  %v327_v0 = vlaneseq  ;;  %p313_p9 = scmp.lt.s32.totalorder %s947_s28, 1  ;;  %v450_v12 = vld [vmem:[%s1119_s2 + $0x18] sm:$0xff]  ;;  %v321_v13 = vld [vmem:[%s1016_s16 + $0x20] sm:$0xff]  ;;  %s709_s18 = sshll.u32 %s1012_s22, 3  ;;  %vm390_vm0 = vcmask 261120  }
  0x2a   : > { %491 = vmatpush.msra.mxu0 %v450_v12  ;;  %v449_v14 = vld [vmem:[%s1119_s2 + $0x10] sm:$0xff]  ;;  %v317_v17 = vld [vmem:[%s1016_s16] sm:$0xff]  ;;  %v448_v18 = vld [vmem:[%s1119_s2 + $0x8] sm:$0xff]  ;;  %v882_v26 = vmov 0.0   ;;  %vm463_vm1 = vcmask 1041409   ;;  %vm465_vm2 = vcmask 1042434  }
  0x2b   : > { %v328_v1 = vshrl.u32 %v327_v0, 7  ;;  %s314_s21 = scalar_select %p313_p9, %s947_s28, 1  ;;  %v319_v15 = vld [vmem:[%s1016_s16 + $0x10] sm:$0xff]  ;;  %v447_v19 = vld [vmem:[%s1119_s2] sm:$0xff]  ;;  %v322_v21 = vld [vmem:[%s1016_s16 + $0x28] sm:$0xff]  ;;  %vm467_vm3 = vcmask 1043459  }
  0x2c   : > { %492 = vmatpush.msra.mxu0 %v449_v14  ;;  %v320_v36 = vld [vmem:[%s1016_s16 + $0x18] sm:$0xff]  ;;  %v318_v37 = vld [vmem:[%s1016_s16 + $0x8] sm:$0xff]  ;;  %v323_v57 = vld [vmem:[%s1016_s16 + $0x30] sm:$0xff]  ;;  %vm469_vm4 = vcmask 1044484   ;;  %vm471_vm5 = vcmask 1045509   ;;  %vm473_vm6 = vcmask 1046534  }
  0x2d   : > { %774 = vset.pattern.permute.xlu1 %v328_v1  ;;  %773 = vset.pattern.permute.xlu0 %v328_v1  ;;  %s710_s23 = sshll.u32 %s314_s21, 3  ;;  %v324_v56 = vld [vmem:[%s1016_s16 + $0x38] sm:$0xff]  ;;  %vm475_vm7 = vcmask 1047559   ;;  %vm508_vm8 = vcmask 1044480   ;;  %vm504_vm9 = vcmask 39936   ;;  %s884_s19 = smov 32  }
  0x2e   : > { %s316_s17 = scalar_lea.vmem %s1118_s1, %s710_s23  ;;  %775 = vset.pattern.permute.xlu2 %v328_v1  ;;  %493 = vmatpush.msra.mxu0 %v448_v18  ;;  %s1044_s23 = scalar_lea.vmem [#allocation5], %s709_s18  ;;  %vm590_vm14 = vcmask 523520   ;;  %vm595_vm15 = vcmask 564736  }
  0x2f   : > { %v325_v2 = vld [vmem:[%s316_s17] sm:$0xff]  ;;  %583 = vst [vmem:[%s1044_s23] sm:$0xff] %v882_v26  ;;  %s883_s18 = smov 64   ;;  %s885_s10 = smov 69  }
  0x30   : > { %v340_v3 = vperm.slane %v325_v2, 2  ;;  %v326_v4 = vperm.slane %v325_v2, 0  ;;  %v354_v5 = vperm.slane %v325_v2, 4  ;;  %v347_v6 = vperm.slane %v325_v2, 3  ;;  %494 = vmatpush.msra.mxu0 %v447_v19  ;;  %s717_s9 = sshll.u32 %s947_s28, 3  ;;  %s616_s8 = sshll.u32 %s1044_s23, 4  ;;  %s617_s8 = int_to_ptr.vmem [resolvable:$true] %s616_s8 }
  0x31   : > { %v333_v7 = vperm.slane %v325_v2, 1  ;;  %v361_v8 = vperm.slane %v325_v2, 5  ;;  %v375_v9 = vperm.slane %v325_v2, 7  ;;  %v368_v10 = vperm.slane %v325_v2, 6  ;;  %s614_s29 = scalar_lea.hbm %s1124_s7, %s717_s9  ;;  %s604_s12 = scalar_lea.sflag [#allocation4], %s1012_s22 }
  0x32   : > { %s618_s17 = sshll.u32 %s614_s29, 4  ;;  %s832_s15 = scalar_lea.hbm %s1124_s7, 16  ;;  %s619_s17 = int_to_ptr.hbm [resolvable:$true] %s618_s17 }
  0x33   : > { %s826_s11 = sshra.s32 %s619_s17, 4  ;;  %s827_s11 = int_to_ptr.hbm [resolvable:$true] %s826_s11 }
  0x34   : > { %s828_s28 = scalar_lea.hbm %s827_s11, 8  ;;  %p833_p1 = scmp.lt.s32.totalorder %s827_s11, %s1124_s7 }
  0x35   : > { %345 = vperm.xlu1 %774, %v340_v3   ;;  %331 = vperm.xlu0 %773, %v326_v4   ;;  %p829_p6 = scmp.ne.s32.totalorder %s827_s11, %s828_s28  ;;  %p834_p3 = scmp.lt.s32.totalorder %s832_s15, %s828_s28 }
  0x36   : > { %359 = vperm.xlu2 %775, %v354_v5  }
  0x37   : > { %p830_p13 = pnand %p829_p6, %p976_p11  ;;  %p835_p4 = por %p834_p3, %p833_p1 }
  0x39   : > { %p831_p0 = pneg %p830_p13 }
  0x3b   : > { %p836_p7 = pnand %p835_p4, %p831_p0 }
  0x3d   : > { %352 = vperm.xlu1 %774, %v347_v6   ;;  %338 = vperm.xlu0 %773, %v333_v7  }
  0x3e   : > { %366 = vperm.xlu2 %775, %v361_v8  }
  0x45   : > { %380 = vperm.xlu1 %774, %v375_v9   ;;  %373 = vperm.xlu0 %773, %v368_v10  }
  0x90   : > { %v360_v11 = vpop.permute.xlu2 %359 }
  0x91   : > { %v386_v16 = vmul.f32 %v360_v11, %v321_v13 }
  0x93   : > { %v419_v27 = vsel %vm390_vm0, %v386_v16, 0.0 }
  0x94   : > { %v420_v33 = vrot.slane %v419_v27, 4 }
  0x96   : > { %v421_v41 = vadd.f32 %v420_v33, %v419_v27 }
  0x98   : > { %v367_v20 = vpop.permute.xlu2 %366  ;;  %v422_v51 = vrot.slane %v421_v41, 2 }
  0x99   : > { %v387_v28 = vmul.f32 %v367_v20, %v322_v21 }
  0x9a   : > { %v423_v63 = vadd.f32 %v422_v51, %v421_v41 }
  0x9b   : > { %v426_v35 = vsel %vm390_vm0, %v387_v28, 0.0 }
  0x9c   : > { %v427_v42 = vrot.slane %v426_v35, 4  ;;  %v424_v13 = vrot.slane %v423_v63, 1 }
  0x9e   : > { %v428_v52 = vadd.f32 %v427_v42, %v426_v35  ;;  %v425_v26 = vadd.f32 %v424_v13, %v423_v63  ;;  %v777_v63 = vld [vmem:[%s1122_s5] ss:$0 sm:$0xff] }
  0xa0   : > { %v429_v0 = vrot.slane %v428_v52, 2 }
  0xa2   : > { %v430_v14 = vadd.f32 %v429_v0, %v428_v52 }
  0xa7   : > { %v346_v22 = vpop.permute.xlu1 %345  ;;  %v332_v23 = vpop.permute.xlu0 %331 }
  0xa8   : > { %v384_v24 = vmul.f32 %v346_v22, %v319_v15  ;;  %v382_v25 = vmul.f32 %v332_v23, %v317_v17 }
  0xaa   : > { %v405_v29 = vsel %vm390_vm0, %v384_v24, 0.0  ;;  %v391_v30 = vsel %vm390_vm0, %v382_v25, 0.0  ;;  %v431_v24 = vrot.slane %v430_v14, 1 }
  0xab   : > { %v406_v31 = vrot.slane %v405_v29, 4  ;;  %v392_v32 = vrot.slane %v391_v30, 4 }
  0xac   : > { %v432_v33 = vadd.f32 %v431_v24, %v430_v14 }
  0xad   : > { %v393_v34 = vadd.f32 %v392_v32, %v391_v30  ;;  %v407_v38 = vadd.f32 %v406_v31, %v405_v29 }
  0xaf   : > { %v353_v39 = vpop.permute.xlu1 %352  ;;  %v339_v40 = vpop.permute.xlu0 %338  ;;  %v394_v45 = vrot.slane %v393_v34, 2  ;;  %v408_v46 = vrot.slane %v407_v38, 2 }
  0xb0   : > { %v385_v43 = vmul.f32 %v353_v39, %v320_v36  ;;  %v383_v44 = vmul.f32 %v339_v40, %v318_v37  ;;  %v499_v39 = vld [vmem:[%s1121_s4] sm:$0x1f] }
  0xb1   : > { %v395_v53 = vadd.f32 %v394_v45, %v393_v34  ;;  %v409_v58 = vadd.f32 %v408_v46, %v407_v38  ;;  %712 = vmatpush.msk.msra.mxu1 %vm508_vm8, %v499_v39  ;;  %v776_v40 = vld [vmem:[%s1120_s3] ss:$0 sm:$0xff] }
  0xb2   : > { %v412_v47 = vsel %vm390_vm0, %v385_v43, 0.0  ;;  %v398_v48 = vsel %vm390_vm0, %v383_v44, 0.0 }
  0xb3   : > { %v413_v49 = vrot.slane %v412_v47, 4  ;;  %v399_v50 = vrot.slane %v398_v48, 4  ;;  %v396_v3 = vrot.slane %v395_v53, 1  ;;  %v410_v6 = vrot.slane %v409_v58, 1 }
  0xb5   : > { %v414_v54 = vadd.f32 %v413_v49, %v412_v47  ;;  %v400_v55 = vadd.f32 %v399_v50, %v398_v48  ;;  %v397_v15 = vadd.f32 %v396_v3, %v395_v53  ;;  %v411_v19 = vadd.f32 %v410_v6, %v409_v58  ;;  %v556_v49 = vld [vmem:[%s1123_s6] sm:$0x1f] }
  0xb6   : > { %714 = vmatpush.msk.msra.mxu2 %vm508_vm8, %v556_v49 }
  0xb7   : > { %v415_v59 = vrot.slane %v414_v54, 2  ;;  %v401_v60 = vrot.slane %v400_v55, 2  ;;  %v381_v61 = vpop.permute.xlu1 %380  ;;  %v374_v62 = vpop.permute.xlu0 %373 }
  0xb8   : > { %v389_v1 = vmul.f32 %v381_v61, %v324_v56  ;;  %v388_v2 = vmul.f32 %v374_v62, %v323_v57 }
  0xb9   : > { %v416_v4 = vadd.f32 %v415_v59, %v414_v54  ;;  %v402_v5 = vadd.f32 %v401_v60, %v400_v55 }
  0xba   : > { %v440_v7 = vsel %vm390_vm0, %v389_v1, 0.0  ;;  %v433_v8 = vsel %vm390_vm0, %v388_v2, 0.0 }
  0xbb   : > { %v417_v9 = vrot.slane %v416_v4, 1  ;;  %v403_v10 = vrot.slane %v402_v5, 1  ;;  %v441_v11 = vrot.slane %v440_v7, 4  ;;  %v434_v12 = vrot.slane %v433_v8, 4 }
  0xbd   : > { %v404_v16 = vadd.f32 %v403_v10, %v402_v5  ;;  %v442_v17 = vadd.f32 %v441_v11, %v440_v7  ;;  %v435_v18 = vadd.f32 %v434_v12, %v433_v8  ;;  %v418_v20 = vadd.f32 %v417_v9, %v416_v4 }
  0xbf   : > { %v464_v21 = vsel %vm463_vm1, %v404_v16, %v397_v15  ;;  %v443_v22 = vrot.slane %v442_v17, 2  ;;  %v436_v23 = vrot.slane %v435_v18, 2 }
  0xc0   : > { %v466_v25 = vsel %vm465_vm2, %v411_v19, %v464_v21 }
  0xc1   : > { %v444_v27 = vadd.f32 %v443_v22, %v442_v17  ;;  %v437_v28 = vadd.f32 %v436_v23, %v435_v18  ;;  %v468_v29 = vsel %vm467_vm3, %v418_v20, %v466_v25 }
  0xc2   : > { %v470_v32 = vsel %vm469_vm4, %v425_v26, %v468_v29 }
  0xc3   : > { %v445_v30 = vrot.slane %v444_v27, 1  ;;  %v438_v31 = vrot.slane %v437_v28, 1  ;;  %v472_v36 = vsel %vm471_vm5, %v432_v33, %v470_v32 }
  0xc5   : > { %v439_v34 = vadd.f32 %v438_v31, %v437_v28  ;;  %v446_v35 = vadd.f32 %v445_v30, %v444_v27 }
  0xc7   : > { %v474_v37 = vsel %vm473_vm6, %v439_v34, %v472_v36 }
  0xc8   : > { %v476_v38 = vsel %vm475_vm7, %v446_v35, %v474_v37 }
  0xc9   : > { %711 = vmatmul.msk.f32.vlgmr.msra.gmra.mxu0 %vm390_vm0, %v476_v38  ;;  %585 = vst.msk [vmem:[%s1044_s23] sm:$0xff] %vm390_vm0, %v476_v38  ;;  %vm601_vm0 = vcmask 613928  }
 0x146   : > { %v496_v41 = vpop.f32.mrf.mxu0 }
 0x147   : > { %v497_v42 = vadd.f32 %v776_v40, %v496_v41 }
 0x149   : > { %713 = vmatmul.msk.f32.vlgmr.msra.gmra.mxu1 %vm504_vm9, %v497_v42  ;;  %v532_v43 = vsel %vm504_vm9, %v497_v42, -inf }
 0x14a   : > { %533 = vmax.xlane.f32.xlu2 %v532_v43 }
 0x1bd   : > { %v534_v44 = vpop.xlane.xlu2 %533 }
 0x1be   : > { %v535_v45 = vsub.f32 %v497_v42, %v534_v44 }
 0x1c0   : > { %v536_v46 = vmul.f32 1.442695, %v535_v45 }
 0x1c2   : > { %778 = vpow2.f32 %v536_v46 }
 0x1c6   : > { %v529_v0 = vpop.f32.mrf.mxu1 }
 0x1c7   : > { %v530_v1 = vadd.f32 %v777_v63, %v529_v0 }
 0x1c8   : > { %v779_v47 = vpop.eup %778 }
 0x1c9   : > { %v538_v48 = vsel %vm504_vm9, %v779_v47, 0.0 }
 0x1ca   : > { %539 = vadd.xlane.f32.xlu0 %v538_v48 }
 0x23d   : > { %v540_v50 = vpop.xlane.xlu0 %539 }
 0x23e   : > { %780 = vrcp.f32 %v540_v50  ;;  %v552_v54 = vand.u32 2147483648, %v540_v50  ;;  %v550_v56 = vand.u32 2147483647, %v540_v50  ;;  %vm546_vm11 = vweird.f32 %v540_v50 }
 0x240   : > { %v553_v58 = vor.u32 1.1754944e-38, %v552_v54  ;;  %vm551_vm13 = vcmp.eq.f32.partialorder %v550_v56, 8.507059e+37 }
 0x244   : > { %v781_v51 = vpop.eup %780 }
 0x245   : > { %v542_v52 = vmul.f32 %v781_v51, %v540_v50  ;;  %vm547_vm10 = vweird.f32 %v781_v51 }
 0x246   : > { %vm548_vm12 = vmor %vm546_vm11, %vm547_vm10 }
 0x247   : > { %v543_v53 = vsub.f32 1.0, %v542_v52 }
 0x249   : > { %v544_v55 = vmul.f32 %v781_v51, %v543_v53 }
 0x24b   : > { %v545_v57 = vadd.f32 %v781_v51, %v544_v55 }
 0x24d   : > { %v549_v59 = vsel %vm548_vm12, %v781_v51, %v545_v57 }
 0x24e   : > { %v554_v60 = vsel %vm551_vm13, %v553_v58, %v549_v59 }
 0x24f   : > { %v555_v61 = vmul.f32 %v779_v47, %v554_v60 }
 0x251   : > { %592 = vrot.lane.b32.xlu1 %v555_v61, %s883_s18  ;;  %715 = vmatmul.msk.f32.vlgmr.msra.gmra.mxu2 %vm504_vm9, %v555_v61 }
 0x2c3   : > { %v593_v2 = vpop.permute.xlu1 %592 }
 0x2d4   : > { %v580_v62 = vpop.f32.mrf.mxu2 }
 0x2d5   : > { %587 = vrot.lane.b32.xlu1 %v580_v62, %s884_s19 }
 0x2dd   : > { %598 = vrot.lane.b32.xlu1 %v530_v1, %s885_s10 }
 0x347   : > { %v588_v3 = vpop.permute.xlu1 %587 }
 0x348   : > { %591 = vst.msk [vmem:[%s1044_s23] sm:$0xff] %vm590_vm14, %v588_v3 }
 0x349   : > { %596 = vst.msk [vmem:[%s1044_s23] sm:$0xff] %vm595_vm15, %v593_v2 }
 0x34f   : > { %v599_v4 = vpop.permute.xlu1 %598 }
 0x350   : > { %602 = vst.msk [vmem:[%s1044_s23] sm:$0xff] %vm601_vm0, %v599_v4 }
 0x351   : > { %839 = shalt.err (!%p836_p7)
}
 0x352   : > { %723 = dma.vmem_to_hbm [thread:$0]  (%p976_p11), %s617_s8, 128, %s619_s17, %s604_s12  }
 0x353 PF: > { %s630_s22 = sand.u32 1, %s866_s24   ;;  %p1131_p5 = scmp.ge.s32.totalorder %s878_s27, 2 }
 0x354   : > { %s631_s23 = scalar_lea.sflag [#allocation4], %s630_s22 }
 0x355   : > { %p730_p8 = pnand %p1131_p5, %p980_p12 }
 0x357   : > { %p731_p10 = pneg %p730_p8 }
 0x359   : > { %861 = dma.done.wait (%p731_p10), %s631_s23, 128  }
 0x35a   : > { %863 = vsyncadd (%p731_p10), %s631_s23, 4294967168  ;;  %s1132_s9 = sld [smem:[#allocation8_spill]]  ;;  %p20_p2 = scmp.ge.s32.totalorder %s951_s30, 4  }
 0x35b   : > { %s1133_s24 = smov %s870_s25  ;;  %s1134_s25 = smov %s874_s26 }
 0x35c   : > { %s1136_s27 = smov %s951_s30  ;;  %22 = sbr.rel (!%p20_p2) target bundleno = 5 (0x5), region = 96 }
 0x360   : > { %s1135_s26 = smov %s1132_s9 }
 0x361   :  { %637 = vsyncpa [#allocation3], 1 }
 0x362   :  { %639 = vsyncpa [#allocation3 + $0x1], 1 }
 0x363   :  { %640 = vsyncpa [#allocation4], 1 }
 0x364   :  { %642 = vsyncpa [#allocation4 + $0x1], 1 }

</bundles_post_ra>
